<compile_context>
chip_gen: v6e
topology: v6e:2x2x1
jax: 0.10.0
libtpu: 0.0.40
codegen_flags: <defaults>
</compile_context>

<pallas_src>
import functools

import jax
import jax.numpy as jnp
from jax.experimental import pallas as pl
from jax.experimental.pallas import tpu as pltpu

LANE = 128
SUBLANE = 8


def _round_up(n, m):
    return ((n + m - 1) // m) * m


# ---------------------------------------------------------------------------
# Fused Pallas kernel: x -> [bf16 matmul + f32 bias (+ relu)]*L, layers unrolled
# ---------------------------------------------------------------------------
def fused_ffn_kernel(x_ref, bias_ref, *refs, acts):
    """refs = (w0, w1, ..., w_{L-1}, o_ref); acts is a static tuple."""
    *w_refs, o_ref = refs
    h = x_ref[...].astype(jnp.float32)
    for l, act in enumerate(acts):
        w = w_refs[l][...]                       # bf16 (k_pad, n_pad), resident
        n_pad = w.shape[1]
        b = bias_ref[l, :n_pad]                  # f32 (n_pad,)
        # bf16 x bf16 -> f32 on the MXU; epilogue stays f32.
        h = jnp.dot(h.astype(jnp.bfloat16), w,
                    preferred_element_type=jnp.float32) + b
        if act == "relu":
            h = jnp.maximum(h, 0.0)
    o_ref[...] = h.astype(o_ref.dtype)


def _estimate_vmem_bytes(tm, feat, padded_weights, bias_all, c_pad, max_n_pad):
    wbytes = sum(w.size * w.dtype.itemsize for w in padded_weights)   # Buffered(1)
    bbytes = bias_all.size * bias_all.dtype.itemsize                  # Buffered(1)
    io = 2 * (tm * feat * 4) + 2 * (tm * c_pad * 4)                   # double-buffered x / out
    interm = 2 * tm * max_n_pad * 4                                   # live f32 h (rough)
    return wbytes + bbytes + io + interm


def fused_ffn(x, padded_layers, bias_all, out_dim, *, tm=256):
    """x: [B, F].  padded_layers: list of (W_pad_bf16, act).  bias_all: [L, max_n_pad] f32.

    Returns [B, out_dim]."""
    B, F = x.shape
    L = len(padded_layers)
    acts = tuple(a for _, a in padded_layers)
    c_pad = padded_layers[-1][0].shape[1]
    max_n_pad = bias_all.shape[1]

    # Sublane-aligned batch tile; ensure >= 2 "parallel" grid steps when
    # possible so v7x's second TensorCore gets work.
    tm = min(tm, _round_up(B, SUBLANE))
    if B > SUBLANE:
        tm = min(tm, _round_up(-(-B // 2), SUBLANE))
    grid = (pl.cdiv(B, tm),)

    in_specs = [
        pl.BlockSpec((tm, F), lambda i: (i, 0)),
        pl.BlockSpec((L, max_n_pad), lambda i: (0, 0), pipeline_mode=pl.Buffered(1)),
    ]
    args = [x, bias_all]
    for w, _ in padded_layers:
        k, n = w.shape
        # Whole weight resident; constant index map -> single buffer.
        in_specs.append(
            pl.BlockSpec((k, n), lambda i: (0, 0), pipeline_mode=pl.Buffered(1)))
        args.append(w)

    weights_only = [w for w, _ in padded_layers]
    est = _estimate_vmem_bytes(tm, F, weights_only, bias_all, c_pad, max_n_pad)
    vmem_limit = min(max(int(1.5 * est) + (4 << 20), 32 << 20), 48 << 20)

    out = pl.pallas_call(
        functools.partial(fused_ffn_kernel, acts=acts),
        out_shape=jax.ShapeDtypeStruct((B, c_pad), x.dtype),
        grid=grid,
        in_specs=in_specs,
        out_specs=pl.BlockSpec((tm, c_pad), lambda i: (i, 0)),
        compiler_params=pltpu.CompilerParams(
            dimension_semantics=("parallel",),
            vmem_limit_bytes=vmem_limit,
        ),
    )(*args)
    # NOTE: for large B a consumer should read the lane-padded logits directly
    # instead of paying this extra HBM slice pass; kept for exact output shape.
    return out[:, :out_dim]


# ---------------------------------------------------------------------------
# Parameter construction (mirrors the PyTorch module) + BN folding + padding
# ---------------------------------------------------------------------------
def bn_to_affine(gamma, beta, running_mean, running_var, eps=1e-5):
    scale = gamma / jnp.sqrt(running_var + eps)
    shift = beta - running_mean * scale
    return scale, shift  # flat (N,)


def init_ffn_params(key, num_features, hidden_layers, num_classes):
    params = {}
    dims = [num_features] + list(hidden_layers)

    # Input BatchNorm1d (bn_d0) with synthetic (deterministic) running stats.
    key, k1, k2, k3, k4 = jax.random.split(key, 5)
    params["bn0"] = bn_to_affine(
        1.0 + 0.1 * jax.random.normal(k1, (num_features,), jnp.float32),
        0.1 * jax.random.normal(k2, (num_features,), jnp.float32),
        0.1 * jax.random.normal(k3, (num_features,), jnp.float32),
        jnp.abs(1.0 + 0.1 * jax.random.normal(k4, (num_features,), jnp.float32)),
    )

    # Hidden dense blocks: Linear -> BatchNorm1d -> ReLU (-> Dropout = id).
    params["denses"] = []
    for i in range(len(dims) - 1):
        fan_in, fan_out = dims[i], dims[i + 1]
        key, kw, kb, kg, kbt, km, kv = jax.random.split(key, 7)
        bound = 1.0 / jnp.sqrt(fan_in)
        w = jax.random.uniform(kw, (fan_in, fan_out), jnp.float32, -bound, bound)
        b = jax.random.uniform(kb, (fan_out,), jnp.float32, -bound, bound)
        scale, shift = bn_to_affine(
            1.0 + 0.1 * jax.random.normal(kg, (fan_out,), jnp.float32),
            0.1 * jax.random.normal(kbt, (fan_out,), jnp.float32),
            0.1 * jax.random.normal(km, (fan_out,), jnp.float32),
            jnp.abs(1.0 + 0.1 * jax.random.normal(kv, (fan_out,), jnp.float32)),
        )
        params["denses"].append({"w": w, "b": b, "scale": scale, "shift": shift})

    # Output Linear (no BN; out_activ never applied — see note at top).
    if num_classes > 0:
        fan_in = dims[-1]
        key, kw, kb = jax.random.split(key, 3)
        bound = 1.0 / jnp.sqrt(fan_in)
        params["out"] = {
            "w": jax.random.uniform(kw, (fan_in, num_classes), jnp.float32, -bound, bound),
            "b": jax.random.uniform(kb, (num_classes,), jnp.float32, -bound, bound),
        }
    else:
        params["out"] = None
    return params


def fold_and_pad_params(params):
    """Fold every BN affine into the adjacent Linear (f32), zero-pad N (and the
    matching downstream K) dims to multiples of 128 lanes, cast weights to
    bf16, and concatenate all biases (kept f32) into one (L, max_n_pad) array.

    Returns (padded_layers, bias_all, out_dim)."""
    pre = params["bn0"]  # pending input affine (bn0) to fold into first Linear
    folded = []

    for layer in params["denses"]:
        w, b = layer["w"], layer["b"]
        if pre is not None:
            s, t = pre
            b = b + t @ w
            w = w * s[:, None]
            pre = None
        bs, bt = layer["scale"], layer["shift"]
        w = w * bs[None, :]
        b = b * bs + bt
        folded.append((w, b, "relu"))

    if params["out"] is not None:
        w, b = params["out"]["w"], params["out"]["b"]
        if pre is not None:
            s, t = pre
            b = b + t @ w
            w = w * s[:, None]
            pre = None
        folded.append((w, b, "none"))

    if pre is not None:
        # TODO(synk): configuration with zero Linear layers (bn0 only) not
        # supported by the fused kernel; not reachable for the spec config.
        raise NotImplementedError("FFN with no Linear layers is not supported")

    out_dim = folded[-1][0].shape[1]

    # Pad: N dims -> multiple of 128; downstream K dims match padded N.
    padded = []
    biases = []
    prev_k_pad = folded[0][0].shape[0]  # first K = num_features (full-dim block)
    max_n_pad = max(_round_up(w.shape[1], LANE) for w, _, _ in folded)
    for w, b, act in folded:
        k, n = w.shape
        k_pad, n_pad = prev_k_pad, _round_up(n, LANE)
        wp = jnp.zeros((k_pad, n_pad), jnp.bfloat16).at[:k, :n].set(
            w.astype(jnp.bfloat16))
        bp = jnp.zeros((max_n_pad,), jnp.float32).at[:n].set(b)
        padded.append((wp, act))
        biases.append(bp)
        prev_k_pad = n_pad
    bias_all = jnp.stack(biases, axis=0)  # (L, max_n_pad) f32
    return padded, bias_all, out_dim


def ffn_forward(padded_layers, bias_all, out_dim, x):
    return fused_ffn(x, padded_layers, bias_all, out_dim)


def ffn_reference(params, x):
    """Pure-JAX f32 reference (un-folded) for a sanity check."""
    s0, t0 = params["bn0"]
    x = x * s0 + t0
    for layer in params["denses"]:
        x = x @ layer["w"] + layer["b"]
        x = x * layer["scale"] + layer["shift"]
        x = jnp.maximum(x, 0.0)
    if params["out"] is not None:
        x = x @ params["out"]["w"] + params["out"]["b"]
    return x


# ---------------------------------------------------------------------------
if __name__ == "__main__":
    key = jax.random.PRNGKey(0)
    B, num_features = 16, 32
    hidden_layers = [64, 48]
    num_classes = 8

    key, kx, kp = jax.random.split(key, 3)
    x = jax.random.normal(kx, (B, num_features), jnp.float32)
    params = init_ffn_params(kp, num_features, hidden_layers, num_classes)

    padded_layers, bias_all, out_dim = fold_and_pad_params(params)

    out = ffn_forward(padded_layers, bias_all, out_dim, x)
    out = jax.block_until_ready(out)

    ref = ffn_reference(params, x)
    assert out.shape == (B, num_classes)
    # bf16 weights / bf16 MXU LHS with f32 accumulation: tolerance loosened
    # accordingly (f32 path previously used 1e-4).
    assert jnp.allclose(out, ref, atol=5e-2, rtol=5e-2)

    print("KERNEL_OK")
</pallas_src>

<mosaic_0001>
module attributes {stable_mosaic.version = 11 : i64} {
  func.func @fused_ffn_kernel(%arg0: i32, %arg1: memref<8x32xf32, #tpu.memory_space<vmem>>, %arg2: memref<3x128xf32, #tpu.memory_space<vmem>>, %arg3: memref<32x128xbf16, #tpu.memory_space<vmem>>, %arg4: memref<128x128xbf16, #tpu.memory_space<vmem>>, %arg5: memref<128x128xbf16, #tpu.memory_space<vmem>>, %arg6: memref<8x128xf32, #tpu.memory_space<vmem>>) attributes {dimension_semantics = [#tpu.dimension_semantics<parallel>], iteration_bounds = array<i64: 2>, scalar_prefetch = 0 : i64, scratch_operands = 0 : i64, tpu.core_type = #tpu.core_type<tc>, window_params = [{transform_indices = @transform_0, window_bounds = array<i64: 8, 32>}, {pipeline_mode = #tpu.pipeline_mode<synchronous>, transform_indices = @transform_1, window_bounds = array<i64: 3, 128>}, {pipeline_mode = #tpu.pipeline_mode<synchronous>, transform_indices = @transform_2, window_bounds = array<i64: 32, 128>}, {pipeline_mode = #tpu.pipeline_mode<synchronous>, transform_indices = @transform_3, window_bounds = array<i64: 128, 128>}, {pipeline_mode = #tpu.pipeline_mode<synchronous>, transform_indices = @transform_4, window_bounds = array<i64: 128, 128>}, {transform_indices = @transform_5, window_bounds = array<i64: 8, 128>}]} {
    %c0 = arith.constant 0 : index
    %c0_0 = arith.constant 0 : index
    %0 = vector.load %arg1[%c0, %c0_0] : memref<8x32xf32, #tpu.memory_space<vmem>>, vector<8x32xf32>
    %c0_1 = arith.constant 0 : index
    %c0_2 = arith.constant 0 : index
    %1 = vector.load %arg3[%c0_1, %c0_2] : memref<32x128xbf16, #tpu.memory_space<vmem>>, vector<32x128xbf16>
    %c0_3 = arith.constant 0 : index
    %c0_4 = arith.constant 0 : index
    %2 = vector.load %arg2[%c0_3, %c0_4] : memref<3x128xf32, #tpu.memory_space<vmem>>, vector<1x128xf32>
    %3 = vector.shape_cast %2 : vector<1x128xf32> to vector<128xf32>
    %4 = arith.truncf %0 : vector<8x32xf32> to vector<8x32xbf16>
    %cst = arith.constant dense<0.000000e+00> : vector<8x128xf32>
    %5 = tpu.matmul %4, %1, %cst {dimension_numbers = #tpu.dot_dimension_numbers<[1], [0], [0], [1], [0, 0, 1, 1], [], []>} : vector<8x32xbf16>, vector<32x128xbf16>, vector<8x128xf32> -> vector<8x128xf32>
    %6 = vector.shape_cast %3 : vector<128xf32> to vector<1x128xf32>
    %7 = vector.broadcast %6 : vector<1x128xf32> to vector<8x128xf32>
    %8 = arith.addf %5, %7 : vector<8x128xf32>
    %cst_5 = arith.constant 0.000000e+00 : f32
    %9 = vector.broadcast %cst_5 : f32 to vector<8x128xf32>
    %10 = arith.maximumf %8, %9 : vector<8x128xf32>
    %c0_6 = arith.constant 0 : index
    %c0_7 = arith.constant 0 : index
    %11 = vector.load %arg4[%c0_6, %c0_7] : memref<128x128xbf16, #tpu.memory_space<vmem>>, vector<128x128xbf16>
    %c1 = arith.constant 1 : index
    %c0_8 = arith.constant 0 : index
    %12 = vector.load %arg2[%c1, %c0_8] : memref<3x128xf32, #tpu.memory_space<vmem>>, vector<1x128xf32>
    %13 = vector.shape_cast %12 : vector<1x128xf32> to vector<128xf32>
    %14 = arith.truncf %10 : vector<8x128xf32> to vector<8x128xbf16>
    %cst_9 = arith.constant dense<0.000000e+00> : vector<8x128xf32>
    %15 = tpu.matmul %14, %11, %cst_9 {dimension_numbers = #tpu.dot_dimension_numbers<[1], [0], [0], [1], [0, 0, 1, 1], [], []>} : vector<8x128xbf16>, vector<128x128xbf16>, vector<8x128xf32> -> vector<8x128xf32>
    %16 = vector.shape_cast %13 : vector<128xf32> to vector<1x128xf32>
    %17 = vector.broadcast %16 : vector<1x128xf32> to vector<8x128xf32>
    %18 = arith.addf %15, %17 : vector<8x128xf32>
    %cst_10 = arith.constant 0.000000e+00 : f32
    %19 = vector.broadcast %cst_10 : f32 to vector<8x128xf32>
    %20 = arith.maximumf %18, %19 : vector<8x128xf32>
    %c0_11 = arith.constant 0 : index
    %c0_12 = arith.constant 0 : index
    %21 = vector.load %arg5[%c0_11, %c0_12] : memref<128x128xbf16, #tpu.memory_space<vmem>>, vector<128x128xbf16>
    %c2 = arith.constant 2 : index
    %c0_13 = arith.constant 0 : index
    %22 = vector.load %arg2[%c2, %c0_13] : memref<3x128xf32, #tpu.memory_space<vmem>>, vector<1x128xf32>
    %23 = vector.shape_cast %22 : vector<1x128xf32> to vector<128xf32>
    %24 = arith.truncf %20 : vector<8x128xf32> to vector<8x128xbf16>
    %cst_14 = arith.constant dense<0.000000e+00> : vector<8x128xf32>
    %25 = tpu.matmul %24, %21, %cst_14 {dimension_numbers = #tpu.dot_dimension_numbers<[1], [0], [0], [1], [0, 0, 1, 1], [], []>} : vector<8x128xbf16>, vector<128x128xbf16>, vector<8x128xf32> -> vector<8x128xf32>
    %26 = vector.shape_cast %23 : vector<128xf32> to vector<1x128xf32>
    %27 = vector.broadcast %26 : vector<1x128xf32> to vector<8x128xf32>
    %28 = arith.addf %25, %27 : vector<8x128xf32>
    %c0_15 = arith.constant 0 : index
    %c0_16 = arith.constant 0 : index
    %29 = vector.load %arg6[%c0_15, %c0_16] : memref<8x128xf32, #tpu.memory_space<vmem>>, vector<8x128xf32>
    tpu.vector_store %arg6[%c0_15, %c0_16], %28 {strides = array<i32>} : memref<8x128xf32, #tpu.memory_space<vmem>>, vector<8x128xf32>,
    return
  }
  func.func @transform_0(%arg0: i32) -> (i32, i32) {
    %c0_i32 = arith.constant 0 : i32
    %c0_i32_0 = arith.constant 0 : i32
    return %arg0, %c0_i32 : i32, i32
  }
  func.func @transform_1(%arg0: i32) -> (i32, i32) {
    %c0_i32 = arith.constant 0 : i32
    %c0_i32_0 = arith.constant 0 : i32
    %c0_i32_1 = arith.constant 0 : i32
    return %c0_i32, %c0_i32_0 : i32, i32
  }
  func.func @transform_2(%arg0: i32) -> (i32, i32) {
    %c0_i32 = arith.constant 0 : i32
    %c0_i32_0 = arith.constant 0 : i32
    %c0_i32_1 = arith.constant 0 : i32
    return %c0_i32, %c0_i32_0 : i32, i32
  }
  func.func @transform_3(%arg0: i32) -> (i32, i32) {
    %c0_i32 = arith.constant 0 : i32
    %c0_i32_0 = arith.constant 0 : i32
    %c0_i32_1 = arith.constant 0 : i32
    return %c0_i32, %c0_i32_0 : i32, i32
  }
  func.func @transform_4(%arg0: i32) -> (i32, i32) {
    %c0_i32 = arith.constant 0 : i32
    %c0_i32_0 = arith.constant 0 : i32
    %c0_i32_1 = arith.constant 0 : i32
    return %c0_i32, %c0_i32_0 : i32, i32
  }
  func.func @transform_5(%arg0: i32) -> (i32, i32) {
    %c0_i32 = arith.constant 0 : i32
    %c0_i32_0 = arith.constant 0 : i32
    return %arg0, %c0_i32 : i32, i32
  }
}

</mosaic_0001>

<bundles_post_ra>
// kernel: tpu_custom_call.1
= control target key start
LH: loop header
LB: loop body
LE: loop exit
PB: predicated region body
PF: predicated region fallthrough
CT: control target
= control target key end

     0   :  { %10 = vsyncpa [#allocation3], 0  ;;  %s1418_s0 = inlined_call_operand.hbm [shape: f32[16,32], index: 0, kind: input, shape index: {}]   ;;  %s1419_s1 = inlined_call_operand.hbm [shape: f32[3,128], index: 1, kind: input, shape index: {}]   ;;  %s1420_s2 = inlined_call_operand.hbm [shape: bf16[32,128], index: 2, kind: input, shape index: {}]   ;;  %s1421_s3 = inlined_call_operand.hbm [shape: bf16[128,128], index: 3, kind: input, shape index: {}]   ;;  %s1422_s4 = inlined_call_operand.hbm [shape: bf16[128,128], index: 4, kind: input, shape index: {}]   ;;  %s1423_s5 = inlined_call_operand.hbm [shape: f32[16,128], index: 5, kind: output, shape index: {}]  }
   0x1   :  { %12 = vsyncpa [#allocation3 + $0x1], 0 }
   0x2   :  { %13 = vsyncpa [#allocation6], 0 }
   0x3   :  { %14 = vsyncpa [#allocation9], 0 }
   0x4   :  { %15 = vsyncpa [#allocation4], 0 }
   0x5   :  { %17 = vsyncpa [#allocation4 + $0x1], 0  ;;  %s1175_s18 = smov 0   ;;  %s1177_s19 = smov 0  }
   0x6   :  { %s1179_s20 = smov 0   ;;  %s1181_s21 = smov 0  }
   0x7 LB: > { %s1135_s22 = smov [#allocation5]   ;;  %s1196_s24 = sadd.s32 4294967295, %s1133_s21   ;;  %s1133_s21 = sphi %s1181_s21, %s1447_s21   ;;  %s1129_s20 = sphi %s1179_s20, %s1446_s20   ;;  %s1125_s19 = sphi %s1177_s19, %s1445_s19   ;;  %s1121_s18 = sphi %s1175_s18, %s1444_s18  }
   0x8   : > { %s177_s23 = sshll.u32 %s1135_s22, 4  ;;  %p710_p0 = scmp.ge.s32.totalorder %s1133_s21, 1  ;;  %s178_s23 = int_to_ptr.vmem [resolvable:$true] %s177_s23 }
   0x9   : > { %p1424_p1 = scmp.eq.s32.totalorder %s1196_s24, 0  ;;  %p164_p2 = scmp.lt.s32.totalorder %s1133_s21, 3 }
   0xa   : > { %s1136_s26 = smov [#allocation8]   ;;  %s1137_s29 = smov [#allocation7]  }
   0xb   : > { %p1201_p3 = pnand %p710_p0, %p164_p2  ;;  %s200_s27 = sshll.u32 %s1136_s26, 4  ;;  %s1214_s27 = int_to_ptr.vmem [resolvable:$true] %s200_s27 }
   0xc   : > { %s187_s30 = sshll.u32 %s1137_s29, 4  ;;  %s940_s6 = scalar_lea.vmem %s178_s23, 64  ;;  %s1216_s30 = int_to_ptr.vmem [resolvable:$true] %s187_s30 }
   0xd   : > { %s1428_s25 = scalar_select %p1201_p3, 1, 0 }
   0xe   : > { %p840_p5 = pneg %p1201_p3  ;;  %p941_p8 = scmp.ne.s32.totalorder %s178_s23, %s940_s6 }
   0xf   : > { %p948_p11 = scmp.lt.s32.totalorder %s178_s23, %s178_s23  ;;  %p949_p12 = scmp.lt.s32.totalorder %s940_s6, %s940_s6 }
  0x10   : > { %p1210_p6 = pnand %p840_p5, %p1424_p1 }
  0x11   : > { %p950_p13 = por %p949_p12, %p948_p11 }
  0x12   : > { %p931_p7 = pneg %p1210_p6 }
  0x14   : > { %p943_p9 = pnand %p941_p8, %p931_p7 }
  0x16   : > { %p944_p10 = pneg %p943_p9 }
  0x18   : > { %p951_p0 = pnand %p950_p13, %p944_p10 }
  0x1a   : > { %954 = shalt.err (!%p951_p0)
}
  0x1b   : > { %843 = dma.hbm_to_vmem [thread:$0]  (!%p1210_p6), %s1419_s1, 64, %s178_s23, [#allocation6]  }
  0x1c   : > { %s966_s9 = scalar_lea.vmem %s1214_s27, 1024  ;;  %p974_p9 = scmp.lt.s32.totalorder %s1214_s27, %s1214_s27 }
  0x1d   : > { %p967_p2 = scmp.ne.s32.totalorder %s1214_s27, %s966_s9  ;;  %p975_p10 = scmp.lt.s32.totalorder %s966_s9, %s966_s9 }
  0x1f   : > { %p969_p5 = pnand %p967_p2, %p931_p7  ;;  %p976_p11 = por %p975_p10, %p974_p9 }
  0x21   : > { %p970_p8 = pneg %p969_p5 }
  0x23   : > { %p977_p12 = pnand %p976_p11, %p970_p8 }
  0x25   : > { %980 = shalt.err (!%p977_p12)
}
  0x26   : > { %s1138_s10 = smov 64   ;;  %s1139_s11 = smov 4  }
  0x27   : > { %849 = dma.hbm_to_vmem [thread:$0]  (!%p1210_p6), %s1421_s3, 1024, %s1214_s27, [#allocation9], %s1138_s10, %s1138_s10, %s1139_s11  }
  0x28   : > { %s992_s14 = scalar_lea.vmem %s1216_s30, 256  ;;  %p1000_p5 = scmp.lt.s32.totalorder %s1216_s30, %s1216_s30 }
  0x29   : > { %p993_p13 = scmp.ne.s32.totalorder %s1216_s30, %s992_s14  ;;  %p1001_p8 = scmp.lt.s32.totalorder %s992_s14, %s992_s14 }
  0x2b   : > { %p995_p0 = pnand %p993_p13, %p931_p7  ;;  %p1002_p9 = por %p1001_p8, %p1000_p5 }
  0x2d   : > { %p996_p2 = pneg %p995_p0 }
  0x2f   : > { %p1003_p10 = pnand %p1002_p9, %p996_p2 }
  0x31   : > { %1006 = shalt.err (!%p1003_p10)
}
  0x32   : > { %846 = dma.hbm_to_vmem [thread:$0]  (!%p1210_p6), %s1420_s2, 256, %s1216_s30, [#allocation6], %s1138_s10, %s1138_s10, %s1139_s11  }
  0x33   : > { %s1140_s17 = smov [#allocation10]  }
  0x34   : > { %s213_s22 = sshll.u32 %s1140_s17, 4  ;;  %s214_s22 = int_to_ptr.vmem [resolvable:$true] %s213_s22 }
  0x35   : > { %s1018_s23 = scalar_lea.vmem %s214_s22, 1024  ;;  %p1026_p0 = scmp.lt.s32.totalorder %s214_s22, %s214_s22 }
  0x36   : > { %p1019_p11 = scmp.ne.s32.totalorder %s214_s22, %s1018_s23  ;;  %p1027_p2 = scmp.lt.s32.totalorder %s1018_s23, %s1018_s23 }
  0x38   : > { %p1021_p12 = pnand %p1019_p11, %p931_p7  ;;  %p1028_p5 = por %p1027_p2, %p1026_p0 }
  0x3a   : > { %p1022_p13 = pneg %p1021_p12 }
  0x3c   : > { %p1029_p8 = pnand %p1028_p5, %p1022_p13 }
  0x3e   : > { %1032 = shalt.err (!%p1029_p8)
}
  0x3f   : > { %852 = dma.hbm_to_vmem [thread:$0]  (!%p1210_p6), %s1422_s4, 1024, %s214_s22, [#allocation9], %s1138_s10, %s1138_s10, %s1139_s11  }
  0x40   : > { %s709_s29 = sadd.s32 4294967294, %s1133_s21   ;;  %s1264_s28 = sadd.s32 1, %s1133_s21  }
  0x41   : > { %s27_s30 = ssub.s32 %s1133_s21, %s1264_s28  ;;  %s30_s6 = sadd.s32 1, %s1129_s20 }
  0x42   : > { %p28_p7 = scmp.eq.s32.totalorder %s27_s30, 0  ;;  %p37_p9 = scmp.ne.s32.totalorder %s1129_s20, %s1125_s19 }
  0x43   : > { %p38_p10 = scmp.eq.s32.totalorder %s1133_s21, 0  ;;  %p43_p11 = scmp.ne.s32.totalorder %s1125_s19, %s1121_s18 }
  0x44   : > { %s1275_s7 = scalar_select %p28_p7, %s1129_s20, %s30_s6  }
  0x45   : > { %p1277_p12 = por %p38_p10, %p37_p9  ;;  %p1283_p6 = por %p1424_p1, %p43_p11 }
  0x46   : > { %p151_p13 = scmp.eq.s32.totalorder %s1196_s24, 1  ;;  %p157_p0 = scmp.eq.s32.totalorder %s709_s29, 1 }
  0x47   : > { %s1431_s9 = scalar_select %p1283_p6, 1, 0 }
  0x48   : > { %p865_p2 = scmp.lt.s32.totalorder %s1133_s21, 2  ;;  %s227_s10 = sand.u32 1, %s1129_s20  }
  0x49   : > { %p1290_p5 = por %p151_p13, %p37_p9  ;;  %p1294_p8 = por %p157_p0, %p43_p11 }
  0x4a   : > { %s716_s13 = sshll.u32 %s227_s10, 3  ;;  %s717_s14 = sshll.u32 %s1133_s21, 7 }
  0x4b   : > { %s1432_s11 = scalar_select %p1290_p5, 1, 0 }
  0x4c   : > { %s1433_s12 = scalar_select %p1294_p8, 1, 0 }
  0x4d   : > { %s1302_s17 = scalar_lea.hbm %s1418_s0, %s717_s14  ;;  %s231_s22 = scalar_lea.vmem [#allocation2], %s716_s13 }
  0x4e   : > { %s238_s23 = sshll.u32 %s231_s22, 4  ;;  %p1306_p7 = pnand %p865_p2, %p1277_p12  ;;  %s239_s23 = int_to_ptr.vmem [resolvable:$true] %s238_s23 }
  0x4f   : > { %s228_s27 = scalar_lea.sflag [#allocation3], %s227_s10  ;;  %s1033_s29 = scalar_lea.hbm %s1302_s17, 128 }
  0x50   : > { %p1034_p9 = scmp.ne.s32.totalorder %s1302_s17, %s1033_s29  ;;  %p1035_p10 = pneg %p1306_p7 }
  0x51   : > { %s1038_s14 = scalar_lea.hbm %s1418_s0, 256  ;;  %p1039_p0 = scmp.lt.s32.totalorder %s1302_s17, %s1418_s0 }
  0x52   : > { %p1036_p11 = pnand %p1035_p10, %p1034_p9  ;;  %p1040_p12 = scmp.lt.s32.totalorder %s1038_s14, %s1033_s29 }
  0x54   : > { %p1037_p13 = pneg %p1036_p11  ;;  %p1041_p2 = por %p1040_p12, %p1039_p0 }
  0x56   : > { %p1042_p4 = pnand %p1041_p2, %p1037_p13 }
  0x58   : > { %1045 = shalt.err (!%p1042_p4)
}
  0x59   : > { %s1046_s8 = scalar_lea.vmem %s239_s23, 128  ;;  %s1141_s10 = smov [#allocation2]  }
  0x5a   : > { %p1047_p1 = scmp.ne.s32.totalorder %s239_s23, %s1046_s8  ;;  %s1051_s16 = sshll.u32 %s1141_s10, 4  ;;  %s1052_s16 = int_to_ptr.vmem [resolvable:$false] %s1051_s16 }
  0x5b   : > { %s1053_s22 = scalar_lea.vmem %s1052_s16, 256  ;;  %p1054_p9 = scmp.lt.s32.totalorder %s239_s23, %s1052_s16 }
  0x5c   : > { %p1049_p8 = pnand %p1047_p1, %p1035_p10  ;;  %p1055_p11 = scmp.lt.s32.totalorder %s1053_s22, %s1046_s8 }
  0x5e   : > { %p1050_p5 = pneg %p1049_p8  ;;  %p1056_p6 = por %p1055_p11, %p1054_p9 }
  0x60   : > { %p1057_p3 = pnand %p1056_p6, %p1050_p5 }
  0x62   : > { %1060 = shalt.err (!%p1057_p3)
}
  0x63   : > { %856 = dma.hbm_to_vmem [thread:$0]  (!%p1306_p7), %s1302_s17, 128, %s239_s23, %s228_s27  }
  0x64   : > { %p1435_p13 = scmp.ne.s32.totalorder %s1428_s25, 0 }
  0x65   : > { %s1327_s29 = sand.u32 (!%p1435_p13), 1, %s1125_s19   ;;  %p1436_p1 = scmp.ne.s32.totalorder (!%p1435_p13), %s1431_s9, 0 }
  0x66   : > { %247 = sbr.rel (%p1435_p13) target bundleno = 731 (0x2db), region = 40  ;;  %s719_s30 = sshll.u32 (!%p1435_p13), %s1327_s29, 3 }
  0x67   : > { %s250_s6 = scalar_lea.sflag (!%p1435_p13), [#allocation3], %s1327_s29  ;;  %s253_s14 = scalar_lea.vmem (!%p1435_p13), [#allocation2], %s719_s30 }
  0x6b   : > { %1104 = dma.done.wait (%p1436_p1), %s250_s6, 128  }
  0x6c   : > { %1106 = vsyncadd (%p1436_p1), %s250_s6, 4294967168  ;;  %p1437_p3 = scmp.eq.s32.totalorder %s1196_s24, 0 }
  0x6e   : > { %1108 = dma.done.wait (%p1437_p3), [#allocation6], 320   ;;  %p1438_p4 = pmov %p1437_p3 }
  0x6f   : > { %p1439_p6 = pmov %p1437_p3 }
  0x70   : > { %1110 = vsyncadd (%p1438_p4), [#allocation6], 4294966976 }
  0x71   : > { %1112 = dma.done.wait (%p1439_p6), [#allocation9], 2048   ;;  %p1440_p5 = pmov %p1437_p3 }
  0x72   : > { %v1142_v0 = vmov 0.0   ;;  %vm1143_vm0 = vmmov 0   ;;  %v911_v1 = vld [vmem:[#allocation7 + $0x8] sm:$0xff]   ;;  %v912_v2 = vld [vmem:[#allocation7] sm:$0xff]   ;;  %vm320_vm1 = vcmask 261120   ;;  %v915_v7 = vld [vmem:[#allocation8 + $0x28] sm:$0xff]  }
  0x73   : > { %1114 = vsyncadd (%p1440_p5), [#allocation9], 4294965248  ;;  %772 = vmatprep.subr.bf16.mxu0 %v1142_v0  ;;  %776 = vmatprep.mubr.msk.bf16.mxu0 %vm1143_vm0, %v1142_v0  ;;  %v297_v3 = vld [vmem:[%s253_s14] sm:$0xff]  ;;  %v914_v6 = vld [vmem:[#allocation8 + $0x30] sm:$0xff]   ;;  %s748_s25 = sshll.u32 %s1196_s24, 7  ;;  %s295_s9 = scalar_lea.vmem [#allocation11], %s719_s30 }
  0x74   : > { %780 = vmatprep.subr.bf16.mxu1 %v1142_v0  ;;  %796 = vmatprep.mubr.msk.bf16.mxu1 %vm1143_vm0, %v1142_v0  ;;  %v913_v4 = vld [vmem:[#allocation8 + $0x38] sm:$0xff]   ;;  %v303_v5 = vpack.c.bf16 %v297_v3, %v297_v3  ;;  %v916_v8 = vld [vmem:[#allocation8 + $0x20] sm:$0xff]   ;;  %v918_v10 = vld [vmem:[#allocation8 + $0x10] sm:$0xff]   ;;  %s601_s17 = sshll.u32 %s295_s9, 4  ;;  %s1375_s27 = scalar_lea.hbm %s1423_s5, %s748_s25  ;;  %s1377_s17 = int_to_ptr.vmem [resolvable:$true] %s601_s17 }
  0x75   : > { %773 = vmatpush3.bf16.msra.mxu0 %v911_v1  ;;  %781 = vmatpush3.bf16.msra.mxu1 %v913_v4  ;;  %v917_v9 = vld [vmem:[#allocation8 + $0x18] sm:$0xff]   ;;  %v919_v11 = vld [vmem:[#allocation8 + $0x8] sm:$0xff]   ;;  %v920_v12 = vld [vmem:[#allocation8] sm:$0xff]   ;;  %s588_s13 = scalar_lea.sflag [#allocation4], %s1327_s29  ;;  %s1061_s24 = scalar_lea.vmem %s1377_s17, 128 }
  0x76   : > { %774 = vmatprep.subr.bf16.mxu0 %v1142_v0  ;;  %782 = vmatprep.subr.bf16.mxu1 %v1142_v0  ;;  %v921_v13 = vld [vmem:[#allocation10 + $0x38] sm:$0xff]   ;;  %v922_v14 = vld [vmem:[#allocation10 + $0x30] sm:$0xff]   ;;  %v923_v15 = vld [vmem:[#allocation10 + $0x28] sm:$0xff]   ;;  %p1062_p8 = scmp.ne.s32.totalorder %s1377_s17, %s1061_s24  ;;  %p1441_p7 = scmp.ne.s32.totalorder %s1432_s11, 0 }
  0x77   : > { %v924_v16 = vld [vmem:[#allocation10 + $0x20] sm:$0xff]   ;;  %v925_v17 = vld [vmem:[#allocation10 + $0x18] sm:$0xff]   ;;  %v926_v18 = vld [vmem:[#allocation10 + $0x10] sm:$0xff]   ;;  %s1144_s15 = smov [#allocation11]  }
  0x78   : > { %v725_v19 = vld [vmem:[#allocation5] ss:$0 sm:$0xff]  ;;  %v928_v28 = vld [vmem:[#allocation10] sm:$0xff]   ;;  %v729_v29 = vld [vmem:[#allocation5 + $0x1] ss:$0 sm:$0xff]  ;;  %p1063_p10 = pnand %p1062_p8, %p1441_p7  ;;  %s1065_s8 = sshll.u32 %s1144_s15, 4  ;;  %s1066_s8 = int_to_ptr.vmem [resolvable:$false] %s1065_s8 }
  0x79   : > { %775 = vmatpush3.bf16.msra.mxu0 %v912_v2  ;;  %783 = vmatpush3.bf16.msra.mxu1 %v914_v6  ;;  %v927_v27 = vld [vmem:[#allocation10 + $0x8] sm:$0xff]   ;;  %s1067_s10 = scalar_lea.vmem %s1066_s8, 256  ;;  %p1068_p12 = scmp.lt.s32.totalorder %s1377_s17, %s1066_s8 }
  0x7a   : > { %800 = vmatprep.subr.bf16.mxu0 %v1142_v0  ;;  %784 = vmatprep.subr.bf16.mxu1 %v1142_v0  ;;  %v738_v37 = vld [vmem:[#allocation5 + $0x2] ss:$0 sm:$0xff]  ;;  %p1064_p0 = pneg %p1063_p10  ;;  %p1069_p2 = scmp.lt.s32.totalorder %s1067_s10, %s1061_s24 }
  0x7c   : > { %777 = vmatmul.mubr.msk.bf16.vlgmr.msra.gmra.mxu0 %vm320_vm1, %v303_v5  ;;  %p1070_p9 = por %p1069_p2, %p1068_p12 }
  0x7d   : > { %816 = vmatprep.mubr.msk.bf16.mxu0 %vm1143_vm0, %v1142_v0  ;;  %785 = vmatpush3.bf16.msra.mxu1 %v915_v7 }
  0x7e   : > { %786 = vmatprep.subr.bf16.mxu1 %v1142_v0  ;;  %801 = vmatpush3.bf16.msra.mxu0 %v921_v13  ;;  %p1071_p11 = pnand %p1070_p9, %p1064_p0 }
  0x7f   : > { %802 = vmatprep.subr.bf16.mxu0 %v1142_v0 }
  0x81   : > { %787 = vmatpush3.bf16.msra.mxu1 %v916_v8 }
  0x82   : > { %788 = vmatprep.subr.bf16.mxu1 %v1142_v0  ;;  %803 = vmatpush3.bf16.msra.mxu0 %v922_v14 }
  0x83   : > { %804 = vmatprep.subr.bf16.mxu0 %v1142_v0 }
  0x85   : > { %789 = vmatpush3.bf16.msra.mxu1 %v917_v9 }
  0x86   : > { %790 = vmatprep.subr.bf16.mxu1 %v1142_v0  ;;  %805 = vmatpush3.bf16.msra.mxu0 %v923_v15 }
  0x87   : > { %806 = vmatprep.subr.bf16.mxu0 %v1142_v0 }
  0x89   : > { %791 = vmatpush3.bf16.msra.mxu1 %v918_v10 }
  0x8a   : > { %792 = vmatprep.subr.bf16.mxu1 %v1142_v0  ;;  %807 = vmatpush3.bf16.msra.mxu0 %v924_v16 }
  0x8b   : > { %808 = vmatprep.subr.bf16.mxu0 %v1142_v0 }
  0x8d   : > { %793 = vmatpush3.bf16.msra.mxu1 %v919_v11 }
  0x8e   : > { %794 = vmatprep.subr.bf16.mxu1 %v1142_v0  ;;  %809 = vmatpush3.bf16.msra.mxu0 %v925_v17 }
  0x8f   : > { %810 = vmatprep.subr.bf16.mxu0 %v1142_v0 }
  0x91   : > { %795 = vmatpush3.bf16.msra.mxu1 %v920_v12 }
  0x92   : > { %811 = vmatpush3.bf16.msra.mxu0 %v926_v18 }
  0x93   : > { %812 = vmatprep.subr.bf16.mxu0 %v1142_v0 }
  0x96   : > { %813 = vmatpush3.bf16.msra.mxu0 %v927_v27 }
  0x97   : > { %814 = vmatprep.subr.bf16.mxu0 %v1142_v0 }
  0x9a   : > { %815 = vmatpush3.bf16.msra.mxu0 %v928_v28 }
 0x13c   : > { %v358_v20 = vpop.f32.mrf.mxu0 }
 0x13d   : > { %v359_v21 = vadd.f32 %v725_v19, %v358_v20 }
 0x13e   : > { %v778_v22 = vpop.f32.mrf.mxu0 }
 0x13f   : > { %v364_v23 = vmax.f32 %v359_v21, 0.0 }
 0x140   : > { %v361_v24 = vpop.f32.mrf.mxu0 }
 0x141   : > { %v382_v25 = vpack.c.bf16 %v364_v23, %v364_v23 }
 0x142   : > { %v779_v26 = vpop.f32.mrf.mxu0 }
 0x143   : > { %797 = vmatmul.mubr.bf16.vlgmr.msra.gmra.mxu1 %v382_v25 }
 0x203   : > { %v469_v30 = vpop.f32.mrf.mxu1 }
 0x204   : > { %v470_v31 = vadd.f32 %v729_v29, %v469_v30 }
 0x205   : > { %v798_v32 = vpop.f32.mrf.mxu1 }
 0x206   : > { %v475_v33 = vmax.f32 %v470_v31, 0.0 }
 0x207   : > { %v472_v34 = vpop.f32.mrf.mxu1 }
 0x208   : > { %v493_v35 = vpack.c.bf16 %v475_v33, %v475_v33 }
 0x209   : > { %v799_v36 = vpop.f32.mrf.mxu1 }
 0x20a   : > { %817 = vmatmul.mubr.bf16.vlgmr.msra.gmra.mxu0 %v493_v35 }
 0x2ca   : > { %v580_v38 = vpop.f32.mrf.mxu0 }
 0x2cb   : > { %v581_v39 = vadd.f32 %v738_v37, %v580_v38 }
 0x2cc   : > { %v818_v40 = vpop.f32.mrf.mxu0 }
 0x2cd   : > { %586 = vst [vmem:[%s295_s9] sm:$0xff] %v581_v39 }
 0x2ce   : > { %v583_v41 = vpop.f32.mrf.mxu0 }
 0x2cf   : > { %1074 = shalt.err (!%p1071_p11)
}
 0x2d0   : > { %s1075_s16 = scalar_lea.hbm %s1375_s27, 128  ;;  %s1079_s30 = scalar_lea.hbm %s1423_s5, 256 }
 0x2d1   : > { %p1076_p13 = scmp.ne.s32.totalorder %s1375_s27, %s1075_s16  ;;  %p1080_p4 = scmp.lt.s32.totalorder %s1375_s27, %s1423_s5 }
 0x2d2   : > { %p1081_p6 = scmp.lt.s32.totalorder %s1079_s30, %s1075_s16 }
 0x2d3   : > { %p1077_p1 = pnand %p1076_p13, %p1441_p7 }
 0x2d4   : > { %p1082_p5 = por %p1081_p6, %p1080_p4 }
 0x2d5   : > { %p1078_p3 = pneg %p1077_p1 }
 0x2d7   : > { %p1083_p8 = pnand %p1082_p5, %p1078_p3 }
 0x2d9   : > { %1086 = shalt.err (!%p1083_p8)
}
 0x2da   : > { %838 = dma.vmem_to_hbm [thread:$0]  (%p1441_p7), %s1377_s17, 128, %s1375_s27, %s588_s13   ;;  %v819_v42 = vpop.f32.mrf.mxu0 }
 0x2db PF: > { %s613_s25 = sand.u32 1, %s1121_s18   ;;  %p1442_p10 = scmp.ne.s32.totalorder %s1433_s12, 0 }
 0x2dc   : > { %p1443_p0 = scmp.ge.s32.totalorder %s1133_s21, 2  ;;  %s614_s9 = scalar_lea.sflag [#allocation4], %s613_s25 }
 0x2de   : > { %p858_p12 = pnand %p1443_p0, %p1442_p10 }
 0x2e0   : > { %p859_p2 = pneg %p858_p12 }
 0x2e2   : > { %1116 = dma.done.wait (%p859_p2), %s614_s9, 128  }
 0x2e3   : > { %1118 = vsyncadd (%p859_p2), %s614_s9, 4294967168  ;;  %p20_p9 = scmp.ge.s32.totalorder %s1264_s28, 4   ;;  %s1444_s18 = smov %s1125_s19 }
 0x2e4   : > { %s1445_s19 = smov %s1129_s20  ;;  %s1446_s20 = smov %s1275_s7 }
 0x2e5   : > { %s1447_s21 = smov %s1264_s28  ;;  %22 = sbr.rel (!%p20_p9) target bundleno = 7 (0x7), region = 101 }
 0x2ea   :  { %619 = vsyncpa [#allocation3], 1 }
 0x2eb   :  { %621 = vsyncpa [#allocation3 + $0x1], 1 }
 0x2ec   :  { %622 = vsyncpa [#allocation6], 1 }
 0x2ed   :  { %623 = vsyncpa [#allocation9], 1 }
 0x2ee   :  { %624 = vsyncpa [#allocation4], 1 }
 0x2ef   :  { %626 = vsyncpa [#allocation4 + $0x1], 1 }

</bundles_post_ra>
